<compile_context>
chip_gen: v5e
topology: v5e:2x2
jax: 0.10.0
libtpu: 0.0.40
codegen_flags: <defaults>
</compile_context>

<pallas_src>
import functools

import jax
import jax.numpy as jnp
from jax.experimental import pallas as pl
from jax.experimental.pallas import tpu as pltpu


# --------------------------------------------------------------------------
# VMEM / tiling helpers (generation-aware).
# --------------------------------------------------------------------------
def _vmem_capacity_bytes():
    try:
        cap = getattr(pltpu.get_tpu_info(), "vmem_capacity_bytes", None)
        if cap:
            return int(cap)
    except Exception:
        pass
    return 64 << 20  # conservative: v7x per-TensorCore VMEM


def _usable_vmem_bytes():
    # Leave ~20% headroom for compiler-internal scratch.
    return max(32 << 20, (_vmem_capacity_bytes() * 4) // 5)


def _choose_tm(n, hf, resident_bytes):
    """Destination-row tile: multiple of 32 (int8 sublane tiling), the largest
    that keeps the per-block working set under usable VMEM after subtracting
    the single-buffered resident arrays (which do not scale with TM)."""
    budget = max(1 << 20, _usable_vmem_bytes() - resident_bytes)
    bytes_per_row = 24 * n + 8 * hf + 256  # packed mask + f32 intermediates + out
    budget_rows = max(32, budget // bytes_per_row)
    for tm in (1024, 512, 256, 128, 64, 32):
        if tm <= budget_rows and tm <= n and n % tm == 0:
            return tm
    # TODO(synk): pad N (with masking) instead of falling back to one block.
    return n


def _compiler_params(est_bytes):
    vmem = int(min(max(est_bytes, 32 << 20), _usable_vmem_bytes()))
    return pltpu.CompilerParams(dimension_semantics=("parallel",),
                                vmem_limit_bytes=vmem)


def _resident_spec(shape, index_map):
    """Constant-index-map input: request single buffering (no double buffer)."""
    try:
        return pl.BlockSpec(shape, index_map, pipeline_mode=pl.Buffered(1))
    except Exception:  # older API without pipeline_mode / Buffered
        return pl.BlockSpec(shape, index_map)


# --------------------------------------------------------------------------
# Kernel 1: projection + folded attention scores in ONE bf16 MXU matmul.
# --------------------------------------------------------------------------
def project_kernel(h_ref, w_ref, feat_ref, scores_ref, *, hf):
    # [feat | el | er] = h @ [W | Wl | Wr]   (bf16 operands, f32 accumulation)
    proj = jnp.dot(h_ref[...], w_ref[...], preferred_element_type=jnp.float32)
    feat_ref[...] = proj[:, :hf].astype(feat_ref.dtype)   # tile-aligned slice
    scores_ref[...] = proj[:, hf:]                         # (tm, 2H) f32


# --------------------------------------------------------------------------
# Kernel 2: masked-softmax attention + aggregation + constraint losses,
# tiled over destination-node row blocks.
# --------------------------------------------------------------------------
def attention_kernel(feat_ref, elt_ref, er_ref, mask_ref, stat_ref,
                     out_ref, loss_ref, *,
                     num_heads, f_out, negative_slope,
                     graph_margin, class_margin, apply_elu):
    mask = mask_ref[...]                      # (TM, N) int8 in {0, 1, 3}
    adj_b = mask > 0                          # edge present (self-loops incl.)
    same_b = mask > 1                         # edge present AND same class
    feat = feat_ref[...]                      # (N, H*F) bf16, resident
    elt = elt_ref[...]                        # (H, N) f32 src scores, resident
    er = er_ref[...]                          # (TM, H) f32 dst scores
    stats = stat_ref[...]                     # (TM, 4) precomputed reciprocals
    inv_neigh, inv_non = stats[:, 0:1], stats[:, 1:2]
    inv_same, inv_diff = stats[:, 2:3], stats[:, 3:4]

    tm = mask.shape[0]
    lg_rows = jnp.zeros((tm, 1), jnp.float32)
    lb_rows = jnp.zeros((tm, 1), jnp.float32)
    neg = jnp.float32(-1e30)

    for hh in range(num_heads):               # static unroll; H is small
        fh = feat[:, hh * f_out:(hh + 1) * f_out]          # (N, F) bf16
        # e[i, j]: score of edge src j -> dst i; pure broadcast add, no
        # per-head transpose (el arrives pre-transposed as (H, N)).
        e = er[:, hh:hh + 1] + elt[hh:hh + 1, :]
        e = jnp.where(e > 0, e, negative_slope * e)        # leaky ReLU

        # Masked softmax over incoming edges; exp of masked entries
        # underflows to exactly 0, so no second mask is needed.
        e_masked = jnp.where(adj_b, e, neg)
        row_max = jnp.max(e_masked, axis=1, keepdims=True)
        p = jnp.exp(e_masked - row_max)                    # unnormalized
        denom = jnp.sum(p, axis=1, keepdims=True)          # (TM, 1)

        # Aggregate with unnormalized bf16 p on the MXU, then scale the small
        # (TM, F) result with an EUP reciprocal (avoids a (TM, N) divide).
        out_h = jnp.dot(p.astype(fh.dtype), fh,
                        preferred_element_type=jnp.float32)
        out_h = out_h * pl.reciprocal(denom, approx=True)
        if apply_elu:
            out_h = jnp.where(out_h > 0, out_h, jnp.exp(out_h) - 1.0)
        # Stream each head straight into its output columns (no concat).
        out_ref[:, hh * f_out:(hh + 1) * f_out] = out_h.astype(out_ref.dtype)

        # TODO(synk): exact CGAT constraint-loss formulation (incl. top_k
        # neighbour selection) is not in the provided source; hinge margin
        # losses over the pre-softmax attention scores are used instead.
        ea = jnp.where(adj_b, e, 0.0)
        eas = jnp.where(same_b, e, 0.0)
        sum_e = jnp.sum(e, axis=1, keepdims=True)
        sum_ea = jnp.sum(ea, axis=1, keepdims=True)
        sum_eas = jnp.sum(eas, axis=1, keepdims=True)
        mean_neigh = sum_ea * inv_neigh
        mean_non = (sum_e - sum_ea) * inv_non
        lg_rows = lg_rows + jnp.maximum(
            graph_margin - (mean_neigh - mean_non), 0.0)
        mean_same = sum_eas * inv_same
        mean_diff = (sum_ea - sum_eas) * inv_diff
        lb_rows = lb_rows + jnp.maximum(
            class_margin - (mean_same - mean_diff), 0.0)

    inv_h = jnp.float32(1.0 / num_heads)
    loss_ref[:, 0:1] = lg_rows * inv_h
    loss_ref[:, 1:2] = lb_rows * inv_h


# --------------------------------------------------------------------------
# Layer wrapper.
# --------------------------------------------------------------------------
def cgat_layer(h, w, al, ar, mask_i8, stats, *, num_heads, f_out,
               negative_slope, graph_margin, class_margin, apply_elu):
    n, f_in = h.shape
    hf = num_heads * f_out
    nh2 = 2 * num_heads

    # Fold the attention vectors into the projection weight (host side, tiny):
    # Wl[:, h] = W[:, h*F:(h+1)*F] @ a_l[h];  Wr likewise.
    w3 = w.reshape(f_in, num_heads, f_out)
    wl = jnp.einsum("ihf,hf->ih", w3, al)
    wr = jnp.einsum("ihf,hf->ih", w3, ar)
    wcat = jnp.concatenate([w, wl, wr], axis=1).astype(jnp.bfloat16)

    resident2 = 2 * n * hf + 4 * num_heads * n       # bf16 feat + f32 el_t
    tm = _choose_tm(n, hf, resident2)
    grid = (n // tm,)

    # --- kernel 1: projection (+ folded attention scores) ---
    est1 = (2 * f_in * (hf + nh2)
            + 2 * (2 * tm * f_in + 2 * tm * hf + 4 * tm * nh2)
            + 4 * tm * (hf + nh2) + (4 << 20))
    feat, scores = pl.pallas_call(
        functools.partial(project_kernel, hf=hf),
        out_shape=(jax.ShapeDtypeStruct((n, hf), jnp.bfloat16),
                   jax.ShapeDtypeStruct((n, nh2), jnp.float32)),
        grid=grid,
        in_specs=[pl.BlockSpec((tm, f_in), lambda i: (i, 0)),
                  _resident_spec((f_in, hf + nh2), lambda i: (0, 0))],
        out_specs=(pl.BlockSpec((tm, hf), lambda i: (i, 0)),
                   pl.BlockSpec((tm, nh2), lambda i: (i, 0))),
        compiler_params=_compiler_params(est1),
    )(h.astype(jnp.bfloat16), wcat)

    el_t = scores[:, :num_heads].T            # (H, N) lane-dense src scores
    er = scores[:, num_heads:]                # (N, H) dst scores

    # --- kernel 2: attention + aggregation + constraint-loss kernel ---
    kern = functools.partial(
        attention_kernel, num_heads=num_heads, f_out=f_out,
        negative_slope=negative_slope, graph_margin=graph_margin,
        class_margin=class_margin, apply_elu=apply_elu)
    est2 = (resident2
            + 2 * (tm * n + 4 * tm * num_heads + 16 * tm + 2 * tm * hf + 8 * tm)
            + 20 * tm * n + (4 << 20))
    out, loss_rows = pl.pallas_call(
        kern,
        out_shape=(jax.ShapeDtypeStruct((n, hf), jnp.bfloat16),
                   jax.ShapeDtypeStruct((n, 2), jnp.float32)),
        grid=grid,
        in_specs=[_resident_spec((n, hf), lambda i: (0, 0)),        # feat
                  _resident_spec((num_heads, n), lambda i: (0, 0)), # el_t
                  pl.BlockSpec((tm, num_heads), lambda i: (i, 0)),  # er rows
                  pl.BlockSpec((tm, n), lambda i: (i, 0)),          # packed mask
                  pl.BlockSpec((tm, 4), lambda i: (i, 0))],         # 1/deg stats
        out_specs=(pl.BlockSpec((tm, hf), lambda i: (i, 0)),
                   pl.BlockSpec((tm, 2), lambda i: (i, 0))),
        compiler_params=_compiler_params(est2),
    )(feat, el_t, er, mask_i8, stats)

    return out, jnp.mean(loss_rows[:, 0]), jnp.mean(loss_rows[:, 1])


def gat_forward(params, adj, same, x, *, negative_slope, graph_margin,
                class_margin):
    """Mirrors GAT.forward: per-layer CGATConv, flatten heads for hidden
    layers, mean over heads for the last layer, accumulate Lg / Lb."""
    n = adj.shape[0]
    adj_same = adj * same
    # Single packed int8 edge plane: 0 no edge, 1 edge, 3 edge + same class.
    mask_i8 = (adj + 2.0 * adj_same).astype(jnp.int8)
    # Per-node degree statistics are layer-independent: precompute reciprocals
    # of |neighbours|, |non-neighbours|, |same-class|, |diff-class| once.
    deg = jnp.maximum(adj.sum(axis=1, keepdims=True), 1.0)
    n_same = adj_same.sum(axis=1, keepdims=True)
    stats = jnp.concatenate([
        1.0 / deg,
        1.0 / jnp.maximum(jnp.float32(n) - deg, 1.0),
        1.0 / jnp.maximum(n_same, 1.0),
        1.0 / jnp.maximum(deg - n_same, 1.0)], axis=1).astype(jnp.float32)

    h = x.astype(jnp.bfloat16)
    lg_all = jnp.float32(0.0)
    lb_all = jnp.float32(0.0)
    num_layers = len(params)
    for l, p in enumerate(params):
        last = (l == num_layers - 1)
        out, lg, lb = cgat_layer(
            h, p["w"], p["al"], p["ar"], mask_i8, stats,
            num_heads=p["heads"], f_out=p["f_out"],
            negative_slope=negative_slope, graph_margin=graph_margin,
            class_margin=class_margin, apply_elu=not last)
        if last:
            # h.mean(1) over the head axis.
            h = out.reshape(out.shape[0], p["heads"], p["f_out"]).mean(axis=1)
        else:
            # h.flatten(1): out is already (N, H*F_out) head-major.
            h = out
        lg_all = lg_all + lg
        lb_all = lb_all + lb
    return h.astype(jnp.float32), lg_all, lb_all


def make_params(key, in_dim, num_hidden, num_classes, heads, num_layers):
    params = []
    dims_in = in_dim
    for l in range(num_layers):
        last = (l == num_layers - 1)
        f_out = num_classes if last else num_hidden
        h_heads = heads[l]
        key, kw, kl, kr = jax.random.split(key, 4)
        scale = (2.0 / (dims_in + h_heads * f_out)) ** 0.5
        params.append({
            "w": scale * jax.random.normal(kw, (dims_in, h_heads * f_out),
                                           dtype=jnp.float32),
            "al": 0.1 * jax.random.normal(kl, (h_heads, f_out), dtype=jnp.float32),
            "ar": 0.1 * jax.random.normal(kr, (h_heads, f_out), dtype=jnp.float32),
            "heads": h_heads,
            "f_out": f_out,
        })
        dims_in = h_heads * f_out
    return params


if __name__ == "__main__":
    # Small deterministic problem: N=256 nodes, in_dim=64, hidden=64,
    # 7 classes, 2 layers with heads=[4, 1].
    N, IN_DIM, NUM_HIDDEN, NUM_CLASSES = 256, 64, 64, 7
    NUM_LAYERS, HEADS = 2, [4, 1]
    NEG_SLOPE, GRAPH_MARGIN, CLASS_MARGIN = 0.2, 0.1, 0.1

    key = jax.random.PRNGKey(0)
    key, kx, ka, klab, kp = jax.random.split(key, 5)

    x = jax.random.normal(kx, (N, IN_DIM), dtype=jnp.float32)

    # Random symmetric graph with self-loops, dense adjacency (dst, src).
    a = jax.random.bernoulli(ka, 0.05, (N, N))
    adj = jnp.maximum(a, a.T).astype(jnp.float32)
    adj = jnp.maximum(adj, jnp.eye(N, dtype=jnp.float32))

    labels = jax.random.randint(klab, (N,), 0, NUM_CLASSES)
    same = (labels[:, None] == labels[None, :]).astype(jnp.float32)

    params = make_params(kp, IN_DIM, NUM_HIDDEN, NUM_CLASSES, HEADS, NUM_LAYERS)

    h_out, lg_all, lb_all = gat_forward(
        params, adj, same, x,
        negative_slope=NEG_SLOPE, graph_margin=GRAPH_MARGIN,
        class_margin=CLASS_MARGIN)

    jax.block_until_ready((h_out, lg_all, lb_all))
    assert h_out.shape == (N, NUM_CLASSES)
    assert jnp.isfinite(h_out).all()
    assert jnp.isfinite(lg_all) and jnp.isfinite(lb_all)
    print("KERNEL_OK")
</pallas_src>

<mosaic_0001>
module attributes {stable_mosaic.version = 11 : i64} {
  func.func @project_kernel(%arg0: i32, %arg1: memref<256x64xbf16, #tpu.memory_space<vmem>>, %arg2: memref<64x264xbf16, #tpu.memory_space<vmem>>, %arg3: memref<256x256xbf16, #tpu.memory_space<vmem>>, %arg4: memref<256x8xf32, #tpu.memory_space<vmem>>) attributes {dimension_semantics = [#tpu.dimension_semantics<parallel>], iteration_bounds = array<i64: 1>, scalar_prefetch = 0 : i64, scratch_operands = 0 : i64, tpu.core_type = #tpu.core_type<tc>, window_params = [{transform_indices = @transform_0, window_bounds = array<i64: 256, 64>}, {pipeline_mode = #tpu.pipeline_mode<synchronous>, transform_indices = @transform_1, window_bounds = array<i64: 64, 264>}, {transform_indices = @transform_2, window_bounds = array<i64: 256, 256>}, {transform_indices = @transform_3, window_bounds = array<i64: 256, 8>}]} {
    %c0 = arith.constant 0 : index
    %c0_0 = arith.constant 0 : index
    %0 = vector.load %arg1[%c0, %c0_0] : memref<256x64xbf16, #tpu.memory_space<vmem>>, vector<256x64xbf16>
    %c0_1 = arith.constant 0 : index
    %c0_2 = arith.constant 0 : index
    %1 = vector.load %arg2[%c0_1, %c0_2] : memref<64x264xbf16, #tpu.memory_space<vmem>>, vector<64x264xbf16>
    %cst = arith.constant dense<0.000000e+00> : vector<256x264xf32>
    %2 = tpu.matmul %0, %1, %cst {dimension_numbers = #tpu.dot_dimension_numbers<[1], [0], [0], [1], [0, 0, 1, 1], [], []>} : vector<256x64xbf16>, vector<64x264xbf16>, vector<256x264xf32> -> vector<256x264xf32>
    %3 = vector.extract_strided_slice %2 {offsets = [0, 0], sizes = [256, 256], strides = [1, 1]} : vector<256x264xf32> to vector<256x256xf32>
    %4 = arith.truncf %3 : vector<256x256xf32> to vector<256x256xbf16>
    %c0_3 = arith.constant 0 : index
    %c0_4 = arith.constant 0 : index
    %5 = vector.load %arg3[%c0_3, %c0_4] : memref<256x256xbf16, #tpu.memory_space<vmem>>, vector<256x256xbf16>
    tpu.vector_store %arg3[%c0_3, %c0_4], %4 {strides = array<i32>} : memref<256x256xbf16, #tpu.memory_space<vmem>>, vector<256x256xbf16>,
    %6 = vector.extract_strided_slice %2 {offsets = [0, 256], sizes = [256, 8], strides = [1, 1]} : vector<256x264xf32> to vector<256x8xf32>
    %c0_5 = arith.constant 0 : index
    %c0_6 = arith.constant 0 : index
    %7 = vector.load %arg4[%c0_5, %c0_6] : memref<256x8xf32, #tpu.memory_space<vmem>>, vector<256x8xf32>
    tpu.vector_store %arg4[%c0_5, %c0_6], %6 {strides = array<i32>} : memref<256x8xf32, #tpu.memory_space<vmem>>, vector<256x8xf32>,
    return
  }
  func.func @transform_0(%arg0: i32) -> (i32, i32) {
    %c0_i32 = arith.constant 0 : i32
    %c0_i32_0 = arith.constant 0 : i32
    return %arg0, %c0_i32 : i32, i32
  }
  func.func @transform_1(%arg0: i32) -> (i32, i32) {
    %c0_i32 = arith.constant 0 : i32
    %c0_i32_0 = arith.constant 0 : i32
    %c0_i32_1 = arith.constant 0 : i32
    return %c0_i32, %c0_i32_0 : i32, i32
  }
  func.func @transform_2(%arg0: i32) -> (i32, i32) {
    %c0_i32 = arith.constant 0 : i32
    %c0_i32_0 = arith.constant 0 : i32
    return %arg0, %c0_i32 : i32, i32
  }
  func.func @transform_3(%arg0: i32) -> (i32, i32) {
    %c0_i32 = arith.constant 0 : i32
    %c0_i32_0 = arith.constant 0 : i32
    return %arg0, %c0_i32 : i32, i32
  }
}

</mosaic_0001>

<bundles_post_ra>
// kernel: tpu_custom_call.1
= control target key start
LH: loop header
LB: loop body
LE: loop exit
PB: predicated region body
PF: predicated region fallthrough
CT: control target
= control target key end

     0   :  { %s1232_s0 = inlined_call_operand.vmem [shape: bf16[256,64], index: 0, kind: input, shape index: {}]   ;;  %s1233_s1 = inlined_call_operand.vmem [shape: bf16[64,264], index: 1, kind: input, shape index: {}]   ;;  %s1234_s2 = inlined_call_operand.hbm [shape: bf16[256,256], index: 2, kind: output, shape index: {0}]   ;;  %s1235_s3 = inlined_call_operand.vmem [shape: f32[256,8], index: 3, kind: output, shape index: {1}]  }
   0x1   :  { %v744_v0 = vld [vmem:[%s1233_s1 + $0x48] sm:$0xf]  ;;  %v828_v1 = vld [vmem:[%s1233_s1 + $0x50] sm:$0xf0]  ;;  %v827_v2 = vld [vmem:[%s1233_s1 + $0x4c] sm:$0xf] }
   0x2   :  { %v745_v3 = vor.u32 %v828_v1, %v744_v0  ;;  %v746_v4 = vld [vmem:[%s1233_s1 + $0x54] sm:$0xf0]  ;;  %v752_v5 = vld [vmem:[%s1233_s1 + $0x50] sm:$0xf]  ;;  %v829_v6 = vld [vmem:[%s1233_s1 + $0x58] sm:$0xf0] }
   0x3   :  { %v749_v7 = vor.u32 %v827_v2, %v746_v4  ;;  %v753_v8 = vor.u32 %v829_v6, %v752_v5  ;;  %v732_v9 = vld [vmem:[%s1233_s1 + $0x30] sm:$0xf]  ;;  %v825_v10 = vld [vmem:[%s1233_s1 + $0x38] sm:$0xf0]  ;;  %v824_v11 = vld [vmem:[%s1233_s1 + $0x34] sm:$0xf] }
   0x4   :  { %260 = vmatpush.bf16.msra.mxu0 %v745_v3  ;;  %830 = vmatpush.bf16.msra.mxu3 %v745_v3  ;;  %v733_v12 = vor.u32 %v825_v10, %v732_v9  ;;  %v734_v13 = vld [vmem:[%s1233_s1 + $0x3c] sm:$0xf0]  ;;  %v740_v14 = vld [vmem:[%s1233_s1 + $0x38] sm:$0xf]  ;;  %v826_v15 = vld [vmem:[%s1233_s1 + $0x40] sm:$0xf0] }
   0x5   :  { %349 = vmatpush.bf16.msra.mxu1 %v749_v7  ;;  %438 = vmatpush.bf16.msra.mxu2 %v753_v8  ;;  %v737_v16 = vor.u32 %v824_v11, %v734_v13  ;;  %v741_v17 = vor.u32 %v826_v15, %v740_v14  ;;  %v720_v18 = vld [vmem:[%s1233_s1 + $0x18] sm:$0xf]  ;;  %v822_v19 = vld [vmem:[%s1233_s1 + $0x20] sm:$0xf0]  ;;  %v821_v20 = vld [vmem:[%s1233_s1 + $0x1c] sm:$0xf] }
   0x6   :  { %v722_v21 = vld [vmem:[%s1233_s1 + $0x24] sm:$0xf0]  ;;  %v728_v22 = vld [vmem:[%s1233_s1 + $0x20] sm:$0xf]  ;;  %v823_v23 = vld [vmem:[%s1233_s1 + $0x28] sm:$0xf0]  ;;  %v721_v24 = vor.u32 %v822_v19, %v720_v18 }
   0x7   :  { %v708_v25 = vld [vmem:[%s1233_s1] sm:$0xf]  ;;  %v725_v26 = vor.u32 %v821_v20, %v722_v21  ;;  %v729_v27 = vor.u32 %v823_v23, %v728_v22  ;;  %v819_v28 = vld [vmem:[%s1233_s1 + $0x8] sm:$0xf0]  ;;  %v818_v29 = vld [vmem:[%s1233_s1 + $0x4] sm:$0xf] }
   0x8   :  { %261 = vmatpush.bf16.msra.mxu0 %v733_v12  ;;  %831 = vmatpush.bf16.msra.mxu3 %v733_v12  ;;  %v710_v30 = vld [vmem:[%s1233_s1 + $0xc] sm:$0xf0]  ;;  %v716_v31 = vld [vmem:[%s1233_s1 + $0x8] sm:$0xf]  ;;  %v820_v32 = vld [vmem:[%s1233_s1 + $0x10] sm:$0xf0] }
   0x9   :  { %350 = vmatpush.bf16.msra.mxu1 %v737_v16  ;;  %439 = vmatpush.bf16.msra.mxu2 %v741_v17 }
   0xa   :  { %9 = vsyncpa [#allocation3], 0  ;;  %v709_v33 = vor.u32 %v819_v28, %v708_v25  ;;  %v713_v34 = vor.u32 %v818_v29, %v710_v30  ;;  %v717_v35 = vor.u32 %v820_v32, %v716_v31  ;;  %v802_v36 = vld [vmem:[%s1232_s0] sm:$0xff]  ;;  %vm207_vm0 = vcmask 523264   ;;  %v803_v38 = vld [vmem:[%s1232_s0 + $0x8] sm:$0xff]  ;;  %s871_s8 = smov [#allocation2]  }
   0xb   :  { %v814_v37 = vld [vmem:[%s1232_s0 + $0x60] sm:$0xff]  ;;  %v982_v39 = vld [vmem:[%s1232_s0 + $0x68] sm:$0xff]  ;;  %v804_v40 = vld [vmem:[%s1232_s0 + $0x10] sm:$0xff]  ;;  %vm587_vm1 = vcmask 64512   ;;  %s624_s9 = sshll.u32 %s871_s8, 4  ;;  %s626_s11 = sshll.u32 %s1234_s2, 4  ;;  %s625_s9 = int_to_ptr.vmem [resolvable:$true] %s624_s9  ;;  %s627_s11 = int_to_ptr.hbm [resolvable:$true] %s626_s11 }
   0xc   :  { %262 = vmatpush.bf16.msra.mxu0 %v721_v24  ;;  %832 = vmatpush.bf16.msra.mxu3 %v721_v24  ;;  %v995_v41 = vld [vmem:[%s1232_s0 + $0x70] sm:$0xff]  ;;  %v805_v42 = vld [vmem:[%s1232_s0 + $0x18] sm:$0xff]  ;;  %v806_v44 = vld [vmem:[%s1232_s0 + $0x20] sm:$0xff]  ;;  %s872_s16 = smov 128   ;;  %s873_s17 = smov 8  }
   0xd   :  { %351 = vmatpush.bf16.msra.mxu1 %v725_v26  ;;  %440 = vmatpush.bf16.msra.mxu2 %v729_v27  ;;  %v1008_v43 = vld [vmem:[%s1232_s0 + $0x78] sm:$0xff]  ;;  %v807_v45 = vld [vmem:[%s1232_s0 + $0x28] sm:$0xff]  ;;  %v808_v46 = vld [vmem:[%s1232_s0 + $0x30] sm:$0xff] }
   0xe   :  { %v809_v47 = vld [vmem:[%s1232_s0 + $0x38] sm:$0xff]  ;;  %v810_v48 = vld [vmem:[%s1232_s0 + $0x40] sm:$0xff]  ;;  %v811_v59 = vld [vmem:[%s1232_s0 + $0x48] sm:$0xff] }
   0xf   :  { %v812_v6 = vld [vmem:[%s1232_s0 + $0x50] sm:$0xff] }
  0x10   :  { %263 = vmatpush.bf16.msra.mxu0 %v709_v33  ;;  %833 = vmatpush.bf16.msra.mxu3 %v709_v33 }
  0x11   :  { %352 = vmatpush.bf16.msra.mxu1 %v713_v34  ;;  %441 = vmatpush.bf16.msra.mxu2 %v717_v35 }
  0x13   :  { %754 = vmatmul.msk.bf16.vlgmr.msra.gmra.mxu0 %vm207_vm0, %v802_v36  ;;  %766 = vmatmul.msk.bf16.vlgmr.msra.gmra.mxu3 %vm207_vm0, %v814_v37 }
  0x14   :  { %834 = vmatpush.bf16.msrb.mxu3 %v749_v7  ;;  %770 = vmatmul.msk.bf16.vlgmr.msra.gmra.mxu1 %vm207_vm0, %v802_v36 }
  0x15   :  { %786 = vmatmul.msk.bf16.vlgmr.msra.gmra.mxu2 %vm207_vm0, %v802_v36 }
  0x18   :  { %835 = vmatpush.bf16.msrb.mxu3 %v737_v16 }
  0x1c   :  { %836 = vmatpush.bf16.msrb.mxu3 %v725_v26 }
  0x20   :  { %837 = vmatpush.bf16.msrb.mxu3 %v713_v34 }
  0x23   :  { %755 = vmatmul.msk.bf16.gmra.mxu0 %vm207_vm0, %v803_v38  ;;  %767 = vmatmul.msk.bf16.gmra.mxu3 %vm207_vm0, %v982_v39 }
  0x24   :  { %838 = vmatpush.bf16.msra.mxu3 %v753_v8  ;;  %771 = vmatmul.msk.bf16.gmra.mxu1 %vm207_vm0, %v803_v38 }
  0x25   :  { %787 = vmatmul.msk.bf16.gmra.mxu2 %vm207_vm0, %v803_v38 }
  0x28   :  { %839 = vmatpush.bf16.msra.mxu3 %v741_v17  ;;  %v813_v17 = vld [vmem:[%s1232_s0 + $0x58] sm:$0xff] }
  0x2c   :  { %840 = vmatpush.bf16.msra.mxu3 %v729_v27 }
  0x30   :  { %841 = vmatpush.bf16.msra.mxu3 %v717_v35 }
  0x33   :  { %756 = vmatmul.msk.bf16.gmra.mxu0 %vm207_vm0, %v804_v40  ;;  %768 = vmatmul.msk.bf16.gmra.mxu3 %vm207_vm0, %v995_v41 }
  0x34   :  { %772 = vmatmul.msk.bf16.gmra.mxu1 %vm207_vm0, %v804_v40 }
  0x35   :  { %788 = vmatmul.msk.bf16.gmra.mxu2 %vm207_vm0, %v804_v40 }
  0x43   :  { %757 = vmatmul.msk.bf16.gmra.mxu0 %vm207_vm0, %v805_v42  ;;  %769 = vmatmul.msk.bf16.gmra.mxu3 %vm207_vm0, %v1008_v43 }
  0x44   :  { %773 = vmatmul.msk.bf16.gmra.mxu1 %vm207_vm0, %v805_v42 }
  0x45   :  { %789 = vmatmul.msk.bf16.gmra.mxu2 %vm207_vm0, %v805_v42 }
  0x53   :  { %758 = vmatmul.msk.bf16.gmra.mxu0 %vm207_vm0, %v806_v44  ;;  %782 = vmatmul.msk.bf16.vlgmr.msrb.gmra.mxu3 %vm207_vm0, %v814_v37 }
  0x54   :  { %774 = vmatmul.msk.bf16.gmra.mxu1 %vm207_vm0, %v806_v44 }
  0x55   :  { %790 = vmatmul.msk.bf16.gmra.mxu2 %vm207_vm0, %v806_v44 }
  0x63   :  { %759 = vmatmul.msk.bf16.gmra.mxu0 %vm207_vm0, %v807_v45  ;;  %783 = vmatmul.msk.bf16.gmra.mxu3 %vm207_vm0, %v982_v39 }
  0x64   :  { %775 = vmatmul.msk.bf16.gmra.mxu1 %vm207_vm0, %v807_v45 }
  0x65   :  { %791 = vmatmul.msk.bf16.gmra.mxu2 %vm207_vm0, %v807_v45 }
  0x73   :  { %760 = vmatmul.msk.bf16.gmra.mxu0 %vm207_vm0, %v808_v46  ;;  %784 = vmatmul.msk.bf16.gmra.mxu3 %vm207_vm0, %v995_v41 }
  0x74   :  { %776 = vmatmul.msk.bf16.gmra.mxu1 %vm207_vm0, %v808_v46 }
  0x75   :  { %792 = vmatmul.msk.bf16.gmra.mxu2 %vm207_vm0, %v808_v46 }
  0x83   :  { %761 = vmatmul.msk.bf16.gmra.mxu0 %vm207_vm0, %v809_v47  ;;  %785 = vmatmul.msk.bf16.gmra.mxu3 %vm207_vm0, %v1008_v43 }
  0x84   :  { %777 = vmatmul.msk.bf16.gmra.mxu1 %vm207_vm0, %v809_v47 }
  0x85   :  { %793 = vmatmul.msk.bf16.gmra.mxu2 %vm207_vm0, %v809_v47 }
  0x90   :  { %v265_v49 = vpop.f32.mrf.mxu0 }
  0x91   :  { %v354_v50 = vpop.f32.mrf.mxu1 }
  0x92   :  { %v523_v51 = vpack.c.bf16 %v354_v50, %v265_v49 }
  0x93   :  { %762 = vmatmul.msk.bf16.gmra.mxu0 %vm207_vm0, %v810_v48  ;;  %798 = vmatmul.msk.bf16.vlgmr.msra.gmra.mxu3 %vm207_vm0, %v814_v37 }
  0x94   :  { %555 = vst [vmem:[#allocation2] sm:$0xff] %v523_v51  ;;  %778 = vmatmul.msk.bf16.gmra.mxu1 %vm207_vm0, %v810_v48 }
  0x95   :  { %794 = vmatmul.msk.bf16.gmra.mxu2 %vm207_vm0, %v810_v48 }
  0x96   :  { %v1053_v52 = vpop.f32.mrf.mxu3 }
  0x98   :  { %v443_v53 = vpop.f32.mrf.mxu2  ;;  %v267_v54 = vpop.f32.mrf.mxu0 }
  0x99   :  { %588 = vst.msk [vmem:[%s1235_s3] sm:$0xff] %vm587_vm1, %v443_v53  ;;  %v356_v55 = vpop.f32.mrf.mxu1 }
  0x9a   :  { %v524_v56 = vpack.c.bf16 %v356_v55, %v267_v54 }
  0x9c   :  { %556 = vst [vmem:[#allocation2 + $0x8] sm:$0xff] %v524_v56 }
  0x9e   :  { %v1059_v57 = vpop.f32.mrf.mxu3 }
  0xa0   :  { %v445_v58 = vpop.f32.mrf.mxu2  ;;  %v270_v60 = vpop.f32.mrf.mxu0 }
  0xa1   :  { %589 = vst.msk [vmem:[%s1235_s3 + $0x8] sm:$0xff] %vm587_vm1, %v445_v58  ;;  %v359_v61 = vpop.f32.mrf.mxu1 }
  0xa2   :  { %v525_v62 = vpack.c.bf16 %v359_v61, %v270_v60 }
  0xa3   :  { %763 = vmatmul.msk.bf16.gmra.mxu0 %vm207_vm0, %v811_v59  ;;  %799 = vmatmul.msk.bf16.gmra.mxu3 %vm207_vm0, %v982_v39 }
  0xa4   :  { %557 = vst [vmem:[#allocation2 + $0x10] sm:$0xff] %v525_v62  ;;  %779 = vmatmul.msk.bf16.gmra.mxu1 %vm207_vm0, %v811_v59 }
  0xa5   :  { %795 = vmatmul.msk.bf16.gmra.mxu2 %vm207_vm0, %v811_v59 }
  0xa6   :  { %v1073_v63 = vpop.f32.mrf.mxu3 }
  0xa8   :  { %v448_v0 = vpop.f32.mrf.mxu2  ;;  %v272_v1 = vpop.f32.mrf.mxu0 }
  0xa9   :  { %590 = vst.msk [vmem:[%s1235_s3 + $0x10] sm:$0xff] %vm587_vm1, %v448_v0  ;;  %v361_v2 = vpop.f32.mrf.mxu1 }
  0xaa   :  { %v526_v3 = vpack.c.bf16 %v361_v2, %v272_v1 }
  0xac   :  { %558 = vst [vmem:[#allocation2 + $0x18] sm:$0xff] %v526_v3 }
  0xae   :  { %v1079_v4 = vpop.f32.mrf.mxu3 }
  0xb0   :  { %v450_v5 = vpop.f32.mrf.mxu2  ;;  %v275_v7 = vpop.f32.mrf.mxu0 }
  0xb1   :  { %591 = vst.msk [vmem:[%s1235_s3 + $0x18] sm:$0xff] %vm587_vm1, %v450_v5  ;;  %v364_v8 = vpop.f32.mrf.mxu1 }
  0xb2   :  { %v527_v9 = vpack.c.bf16 %v364_v8, %v275_v7 }
  0xb3   :  { %764 = vmatmul.msk.bf16.gmra.mxu0 %vm207_vm0, %v812_v6  ;;  %800 = vmatmul.msk.bf16.gmra.mxu3 %vm207_vm0, %v995_v41 }
  0xb4   :  { %559 = vst [vmem:[#allocation2 + $0x20] sm:$0xff] %v527_v9  ;;  %780 = vmatmul.msk.bf16.gmra.mxu1 %vm207_vm0, %v812_v6 }
  0xb5   :  { %796 = vmatmul.msk.bf16.gmra.mxu2 %vm207_vm0, %v812_v6 }
  0xb6   :  { %v1093_v10 = vpop.f32.mrf.mxu3 }
  0xb8   :  { %v453_v11 = vpop.f32.mrf.mxu2  ;;  %v277_v12 = vpop.f32.mrf.mxu0 }
  0xb9   :  { %592 = vst.msk [vmem:[%s1235_s3 + $0x20] sm:$0xff] %vm587_vm1, %v453_v11  ;;  %v366_v13 = vpop.f32.mrf.mxu1 }
  0xba   :  { %v528_v14 = vpack.c.bf16 %v366_v13, %v277_v12 }
  0xbc   :  { %560 = vst [vmem:[#allocation2 + $0x28] sm:$0xff] %v528_v14 }
  0xbe   :  { %v1099_v15 = vpop.f32.mrf.mxu3 }
  0xc0   :  { %v455_v16 = vpop.f32.mrf.mxu2  ;;  %v280_v18 = vpop.f32.mrf.mxu0 }
  0xc1   :  { %593 = vst.msk [vmem:[%s1235_s3 + $0x28] sm:$0xff] %vm587_vm1, %v455_v16  ;;  %v369_v19 = vpop.f32.mrf.mxu1 }
  0xc2   :  { %v529_v20 = vpack.c.bf16 %v369_v19, %v280_v18 }
  0xc3   :  { %765 = vmatmul.msk.bf16.gmra.mxu0 %vm207_vm0, %v813_v17  ;;  %801 = vmatmul.msk.bf16.gmra.mxu3 %vm207_vm0, %v1008_v43 }
  0xc4   :  { %561 = vst [vmem:[#allocation2 + $0x30] sm:$0xff] %v529_v20  ;;  %781 = vmatmul.msk.bf16.gmra.mxu1 %vm207_vm0, %v813_v17 }
  0xc5   :  { %797 = vmatmul.msk.bf16.gmra.mxu2 %vm207_vm0, %v813_v17 }
  0xc6   :  { %v1113_v21 = vpop.f32.mrf.mxu3 }
  0xc8   :  { %v458_v22 = vpop.f32.mrf.mxu2  ;;  %v282_v23 = vpop.f32.mrf.mxu0 }
  0xc9   :  { %594 = vst.msk [vmem:[%s1235_s3 + $0x30] sm:$0xff] %vm587_vm1, %v458_v22  ;;  %v371_v24 = vpop.f32.mrf.mxu1 }
  0xca   :  { %v530_v25 = vpack.c.bf16 %v371_v24, %v282_v23 }
  0xcc   :  { %562 = vst [vmem:[#allocation2 + $0x38] sm:$0xff] %v530_v25 }
  0xce   :  { %v1119_v26 = vpop.f32.mrf.mxu3 }
  0xd0   :  { %v460_v27 = vpop.f32.mrf.mxu2  ;;  %v285_v28 = vpop.f32.mrf.mxu0 }
  0xd1   :  { %595 = vst.msk [vmem:[%s1235_s3 + $0x38] sm:$0xff] %vm587_vm1, %v460_v27  ;;  %v374_v29 = vpop.f32.mrf.mxu1 }
  0xd2   :  { %v531_v30 = vpack.c.bf16 %v374_v29, %v285_v28 }
  0xd4   :  { %563 = vst [vmem:[#allocation2 + $0x40] sm:$0xff] %v531_v30 }
  0xd6   :  { %v414_v31 = vpop.f32.mrf.mxu3 }
  0xd7   :  { %v547_v32 = vpack.c.bf16 %v414_v31, %v1053_v52 }
  0xd8   :  { %v463_v33 = vpop.f32.mrf.mxu2  ;;  %v287_v34 = vpop.f32.mrf.mxu0 }
  0xd9   :  { %596 = vst.msk [vmem:[%s1235_s3 + $0x40] sm:$0xff] %vm587_vm1, %v463_v33  ;;  %v376_v35 = vpop.f32.mrf.mxu1 }
  0xda   :  { %579 = vst [vmem:[#allocation2 + $0xc0] sm:$0xff] %v547_v32  ;;  %v532_v36 = vpack.c.bf16 %v376_v35, %v287_v34 }
  0xdc   :  { %564 = vst [vmem:[#allocation2 + $0x48] sm:$0xff] %v532_v36 }
  0xde   :  { %v416_v37 = vpop.f32.mrf.mxu3 }
  0xdf   :  { %v548_v38 = vpack.c.bf16 %v416_v37, %v1059_v57 }
  0xe0   :  { %v465_v39 = vpop.f32.mrf.mxu2  ;;  %v290_v40 = vpop.f32.mrf.mxu0 }
  0xe1   :  { %597 = vst.msk [vmem:[%s1235_s3 + $0x48] sm:$0xff] %vm587_vm1, %v465_v39  ;;  %v379_v41 = vpop.f32.mrf.mxu1 }
  0xe2   :  { %580 = vst [vmem:[#allocation2 + $0xc8] sm:$0xff] %v548_v38  ;;  %v533_v42 = vpack.c.bf16 %v379_v41, %v290_v40 }
  0xe4   :  { %565 = vst [vmem:[#allocation2 + $0x50] sm:$0xff] %v533_v42 }
  0xe6   :  { %v419_v43 = vpop.f32.mrf.mxu3 }
  0xe7   :  { %v549_v44 = vpack.c.bf16 %v419_v43, %v1073_v63 }
  0xe8   :  { %v468_v45 = vpop.f32.mrf.mxu2  ;;  %v292_v46 = vpop.f32.mrf.mxu0 }
  0xe9   :  { %598 = vst.msk [vmem:[%s1235_s3 + $0x50] sm:$0xff] %vm587_vm1, %v468_v45  ;;  %v381_v47 = vpop.f32.mrf.mxu1 }
  0xea   :  { %581 = vst [vmem:[#allocation2 + $0xd0] sm:$0xff] %v549_v44  ;;  %v534_v48 = vpack.c.bf16 %v381_v47, %v292_v46 }
  0xec   :  { %566 = vst [vmem:[#allocation2 + $0x58] sm:$0xff] %v534_v48 }
  0xee   :  { %v421_v49 = vpop.f32.mrf.mxu3 }
  0xef   :  { %v550_v50 = vpack.c.bf16 %v421_v49, %v1079_v4 }
  0xf0   :  { %v470_v51 = vpop.f32.mrf.mxu2  ;;  %v295_v52 = vpop.f32.mrf.mxu0 }
  0xf1   :  { %599 = vst.msk [vmem:[%s1235_s3 + $0x58] sm:$0xff] %vm587_vm1, %v470_v51  ;;  %v384_v53 = vpop.f32.mrf.mxu1 }
  0xf2   :  { %582 = vst [vmem:[#allocation2 + $0xd8] sm:$0xff] %v550_v50  ;;  %v535_v54 = vpack.c.bf16 %v384_v53, %v295_v52 }
  0xf4   :  { %567 = vst [vmem:[#allocation2 + $0x60] sm:$0xff] %v535_v54 }
  0xf6   :  { %v424_v55 = vpop.f32.mrf.mxu3 }
  0xf7   :  { %v551_v56 = vpack.c.bf16 %v424_v55, %v1093_v10 }
  0xf8   :  { %v473_v57 = vpop.f32.mrf.mxu2  ;;  %v297_v58 = vpop.f32.mrf.mxu0 }
  0xf9   :  { %600 = vst.msk [vmem:[%s1235_s3 + $0x60] sm:$0xff] %vm587_vm1, %v473_v57  ;;  %v386_v59 = vpop.f32.mrf.mxu1 }
  0xfa   :  { %583 = vst [vmem:[#allocation2 + $0xe0] sm:$0xff] %v551_v56  ;;  %v536_v60 = vpack.c.bf16 %v386_v59, %v297_v58 }
  0xfc   :  { %568 = vst [vmem:[#allocation2 + $0x68] sm:$0xff] %v536_v60 }
  0xfe   :  { %v426_v61 = vpop.f32.mrf.mxu3 }
  0xff   :  { %v552_v62 = vpack.c.bf16 %v426_v61, %v1099_v15 }
 0x100   :  { %v475_v63 = vpop.f32.mrf.mxu2  ;;  %v300_v0 = vpop.f32.mrf.mxu0 }
 0x101   :  { %601 = vst.msk [vmem:[%s1235_s3 + $0x68] sm:$0xff] %vm587_vm1, %v475_v63  ;;  %v389_v1 = vpop.f32.mrf.mxu1 }
 0x102   :  { %584 = vst [vmem:[#allocation2 + $0xe8] sm:$0xff] %v552_v62  ;;  %v537_v2 = vpack.c.bf16 %v389_v1, %v300_v0 }
 0x104   :  { %569 = vst [vmem:[#allocation2 + $0x70] sm:$0xff] %v537_v2 }
 0x106   :  { %v429_v3 = vpop.f32.mrf.mxu3 }
 0x107   :  { %v553_v4 = vpack.c.bf16 %v429_v3, %v1113_v21 }
 0x108   :  { %v478_v5 = vpop.f32.mrf.mxu2  ;;  %v302_v6 = vpop.f32.mrf.mxu0 }
 0x109   :  { %602 = vst.msk [vmem:[%s1235_s3 + $0x70] sm:$0xff] %vm587_vm1, %v478_v5  ;;  %v391_v7 = vpop.f32.mrf.mxu1 }
 0x10a   :  { %585 = vst [vmem:[#allocation2 + $0xf0] sm:$0xff] %v553_v4  ;;  %v538_v8 = vpack.c.bf16 %v391_v7, %v302_v6 }
 0x10c   :  { %570 = vst [vmem:[#allocation2 + $0x78] sm:$0xff] %v538_v8 }
 0x10e   :  { %v431_v9 = vpop.f32.mrf.mxu3 }
 0x10f   :  { %v554_v10 = vpack.c.bf16 %v431_v9, %v1119_v26 }
 0x110   :  { %v480_v11 = vpop.f32.mrf.mxu2  ;;  %v305_v12 = vpop.f32.mrf.mxu0 }
 0x111   :  { %603 = vst.msk [vmem:[%s1235_s3 + $0x78] sm:$0xff] %vm587_vm1, %v480_v11  ;;  %v394_v13 = vpop.f32.mrf.mxu1 }
 0x112   :  { %586 = vst [vmem:[#allocation2 + $0xf8] sm:$0xff] %v554_v10  ;;  %v539_v14 = vpack.c.bf16 %v394_v13, %v305_v12 }
 0x114   :  { %571 = vst [vmem:[#allocation2 + $0x80] sm:$0xff] %v539_v14 }
 0x116   :  { %v503_v15 = vpop.f32.mrf.mxu3 }
 0x117   :  { %612 = vst.msk [vmem:[%s1235_s3 + $0xc0] sm:$0xff] %vm587_vm1, %v503_v15 }
 0x118   :  { %v483_v16 = vpop.f32.mrf.mxu2  ;;  %v307_v17 = vpop.f32.mrf.mxu0 }
 0x119   :  { %604 = vst.msk [vmem:[%s1235_s3 + $0x80] sm:$0xff] %vm587_vm1, %v483_v16  ;;  %v396_v18 = vpop.f32.mrf.mxu1 }
 0x11a   :  { %v540_v19 = vpack.c.bf16 %v396_v18, %v307_v17 }
 0x11c   :  { %572 = vst [vmem:[#allocation2 + $0x88] sm:$0xff] %v540_v19 }
 0x11e   :  { %v505_v20 = vpop.f32.mrf.mxu3 }
 0x11f   :  { %613 = vst.msk [vmem:[%s1235_s3 + $0xc8] sm:$0xff] %vm587_vm1, %v505_v20 }
 0x120   :  { %v485_v21 = vpop.f32.mrf.mxu2  ;;  %v310_v22 = vpop.f32.mrf.mxu0 }
 0x121   :  { %605 = vst.msk [vmem:[%s1235_s3 + $0x88] sm:$0xff] %vm587_vm1, %v485_v21  ;;  %v399_v23 = vpop.f32.mrf.mxu1 }
 0x122   :  { %v541_v24 = vpack.c.bf16 %v399_v23, %v310_v22 }
 0x124   :  { %573 = vst [vmem:[#allocation2 + $0x90] sm:$0xff] %v541_v24 }
 0x126   :  { %v508_v25 = vpop.f32.mrf.mxu3 }
 0x127   :  { %614 = vst.msk [vmem:[%s1235_s3 + $0xd0] sm:$0xff] %vm587_vm1, %v508_v25 }
 0x128   :  { %v488_v26 = vpop.f32.mrf.mxu2  ;;  %v312_v27 = vpop.f32.mrf.mxu0 }
 0x129   :  { %606 = vst.msk [vmem:[%s1235_s3 + $0x90] sm:$0xff] %vm587_vm1, %v488_v26  ;;  %v401_v28 = vpop.f32.mrf.mxu1 }
 0x12a   :  { %v542_v29 = vpack.c.bf16 %v401_v28, %v312_v27 }
 0x12c   :  { %574 = vst [vmem:[#allocation2 + $0x98] sm:$0xff] %v542_v29 }
 0x12e   :  { %v510_v30 = vpop.f32.mrf.mxu3 }
 0x12f   :  { %615 = vst.msk [vmem:[%s1235_s3 + $0xd8] sm:$0xff] %vm587_vm1, %v510_v30 }
 0x130   :  { %v490_v31 = vpop.f32.mrf.mxu2  ;;  %v315_v32 = vpop.f32.mrf.mxu0 }
 0x131   :  { %607 = vst.msk [vmem:[%s1235_s3 + $0x98] sm:$0xff] %vm587_vm1, %v490_v31  ;;  %v404_v33 = vpop.f32.mrf.mxu1 }
 0x132   :  { %v543_v34 = vpack.c.bf16 %v404_v33, %v315_v32 }
 0x134   :  { %575 = vst [vmem:[#allocation2 + $0xa0] sm:$0xff] %v543_v34 }
 0x136   :  { %v513_v35 = vpop.f32.mrf.mxu3 }
 0x137   :  { %616 = vst.msk [vmem:[%s1235_s3 + $0xe0] sm:$0xff] %vm587_vm1, %v513_v35 }
 0x138   :  { %v493_v36 = vpop.f32.mrf.mxu2  ;;  %v317_v37 = vpop.f32.mrf.mxu0 }
 0x139   :  { %608 = vst.msk [vmem:[%s1235_s3 + $0xa0] sm:$0xff] %vm587_vm1, %v493_v36  ;;  %v406_v38 = vpop.f32.mrf.mxu1 }
 0x13a   :  { %v544_v39 = vpack.c.bf16 %v406_v38, %v317_v37 }
 0x13c   :  { %576 = vst [vmem:[#allocation2 + $0xa8] sm:$0xff] %v544_v39 }
 0x13e   :  { %v515_v40 = vpop.f32.mrf.mxu3 }
 0x13f   :  { %617 = vst.msk [vmem:[%s1235_s3 + $0xe8] sm:$0xff] %vm587_vm1, %v515_v40 }
 0x140   :  { %v495_v41 = vpop.f32.mrf.mxu2  ;;  %v320_v42 = vpop.f32.mrf.mxu0 }
 0x141   :  { %609 = vst.msk [vmem:[%s1235_s3 + $0xa8] sm:$0xff] %vm587_vm1, %v495_v41  ;;  %v409_v43 = vpop.f32.mrf.mxu1 }
 0x142   :  { %v545_v44 = vpack.c.bf16 %v409_v43, %v320_v42 }
 0x144   :  { %577 = vst [vmem:[#allocation2 + $0xb0] sm:$0xff] %v545_v44 }
 0x146   :  { %v518_v45 = vpop.f32.mrf.mxu3 }
 0x147   :  { %618 = vst.msk [vmem:[%s1235_s3 + $0xf0] sm:$0xff] %vm587_vm1, %v518_v45 }
 0x148   :  { %v498_v46 = vpop.f32.mrf.mxu2  ;;  %v322_v47 = vpop.f32.mrf.mxu0 }
 0x149   :  { %610 = vst.msk [vmem:[%s1235_s3 + $0xb0] sm:$0xff] %vm587_vm1, %v498_v46  ;;  %v411_v48 = vpop.f32.mrf.mxu1 }
 0x14a   :  { %v546_v49 = vpack.c.bf16 %v411_v48, %v322_v47 }
 0x14c   :  { %578 = vst [vmem:[#allocation2 + $0xb8] sm:$0xff] %v546_v49 }
 0x14d   :  { %632 = dma.vmem_to_hbm [thread:$0]  %s625_s9, 4096, %s627_s11, [#allocation3], %s872_s16, %s872_s16, %s873_s17  }
 0x14e   :  { %v520_v50 = vpop.f32.mrf.mxu3 }
 0x14f   :  { %619 = vst.msk [vmem:[%s1235_s3 + $0xf8] sm:$0xff] %vm587_vm1, %v520_v50 }
 0x150   :  { %v500_v51 = vpop.f32.mrf.mxu2 }
 0x151   :  { %611 = vst.msk [vmem:[%s1235_s3 + $0xb8] sm:$0xff] %vm587_vm1, %v500_v51 }
 0x152   :  { %869 = dma.done.wait [#allocation3], 4096  }
 0x153   :  { %870 = vsyncadd [#allocation3], 4294963200 }
 0x154   :  { %641 = vsyncpa [#allocation3], 1 }

</bundles_post_ra>
